<compile_context>
chip_gen: v5e
topology: v5e:2x2
jax: 0.10.0
libtpu: 0.0.40
codegen_flags: <defaults>
</compile_context>

<pallas_src>
import jax
import jax.numpy as jnp
from jax.experimental import pallas as pl
from jax.experimental.pallas import tpu as pltpu


# Tile sizes (upper bounds; shrunk to fit small problems).
_TB_MAX = 64     # multiple of 8 (f32 sublanes) and 16 (bf16 packing)
_TN_MAX = 8192   # 64 lane-tiles; keeps 2 inputs x 2 buffers well under 32 MiB


def _round_up(x, m):
    return ((x + m - 1) // m) * m


def _kl_loss_kernel(pred_ref, target_ref, out_ref, acc_ref):
    k = pl.program_id(1)

    # Zero the resident accumulator at the start of each B-tile's k sweep.
    @pl.when(k == 0)
    def _():
        acc_ref[...] = jnp.zeros_like(acc_ref)

    tb, tn = pred_ref.shape
    n_chunks = tn // 128  # static

    # Fold the (tb, tn) tile into a (tb, 128) partial sum using only VALU adds
    # over 128-lane chunks; keeps vreg live ranges small and the XLU idle.
    partial = jnp.zeros((tb, 128), jnp.float32)
    for j in range(n_chunks):
        sl = slice(j * 128, (j + 1) * 128)
        t = target_ref[:, sl].astype(jnp.float32)
        p = pred_ref[:, sl].astype(jnp.float32)
        safe_t = jnp.where(t > 0, t, 1.0)
        # kl = xlogy(t, t) - t*p  ==  t * (log(t) - p) for t > 0, else 0.
        # TODO(synk): PyTorch propagates NaN for target < 0; this returns 0
        # there (true probability targets assumed).
        partial = partial + jnp.where(t > 0, t * (jnp.log(safe_t) - p), 0.0)

    acc_ref[...] += partial

    # Final cross-lane reduce + narrow (tb, 1) store only once per B-tile.
    @pl.when(k == pl.num_programs(1) - 1)
    def _():
        out_ref[...] = jnp.sum(acc_ref[...], axis=-1, keepdims=True)


def kl_loss(pred, target):
    """pred, target: (B, C, H, W) float arrays (f32 or bf16); returns (B,) f32."""
    assert pred.shape == target.shape
    B = pred.shape[0]
    N = 1
    for d in pred.shape[1:]:
        N *= d

    pred2 = pred.reshape(B, N)
    target2 = target.reshape(B, N)

    # Pick tile sizes (shrunk for small problems, capped for v7x VMEM budget).
    TB = min(_TB_MAX, _round_up(B, 8))
    B_pad = _round_up(B, TB)
    N_pad128 = _round_up(N, 128)
    TN = min(_TN_MAX, N_pad128)
    N_pad = _round_up(N, TN)

    # Zero-pad: padded target entries are 0, so they contribute 0 to the sum.
    if B_pad != B or N_pad != N:
        pred2 = jnp.pad(pred2, ((0, B_pad - B), (0, N_pad - N)))
        target2 = jnp.pad(target2, ((0, B_pad - B), (0, N_pad - N)))

    nb = B_pad // TB
    nk = N_pad // TN

    itemsize = jnp.dtype(pred.dtype).itemsize + jnp.dtype(target.dtype).itemsize
    cost = pl.CostEstimate(
        flops=6 * B * N,
        transcendentals=B * N,
        bytes_accessed=itemsize * B * N + 4 * B,
    )

    out = pl.pallas_call(
        _kl_loss_kernel,
        out_shape=jax.ShapeDtypeStruct((B_pad, 1), jnp.float32),
        grid_spec=pltpu.PrefetchScalarGridSpec(
            num_scalar_prefetch=0,
            grid=(nb, nk),
            in_specs=[
                pl.BlockSpec((TB, TN), lambda b, k: (b, k)),
                pl.BlockSpec((TB, TN), lambda b, k: (b, k)),
            ],
            # Same block across k -> output tile stays resident over the
            # reduction sweep; only written at the last k step.
            out_specs=pl.BlockSpec((TB, 1), lambda b, k: (b, 0)),
            scratch_shapes=[pltpu.VMEM((TB, 128), jnp.float32)],
        ),
        compiler_params=pltpu.CompilerParams(
            dimension_semantics=("parallel", "arbitrary"),
            vmem_limit_bytes=32 * 1024 * 1024,
        ),
        cost_estimate=cost,
    )(pred2, target2)

    return out[:B, 0]


if __name__ == "__main__":
    key = jax.random.PRNGKey(0)
    k1, k2 = jax.random.split(key)

    B, C, H, W = 2, 4, 16, 16
    # pred is expected to be log-probabilities (as F.kl_div expects),
    # target is a probability distribution over the flattened axes.
    logits = jax.random.normal(k1, (B, C, H, W), dtype=jnp.float32)
    pred = jax.nn.log_softmax(logits.reshape(B, -1), axis=-1).reshape(B, C, H, W)
    tlogits = jax.random.normal(k2, (B, C, H, W), dtype=jnp.float32)
    target = jax.nn.softmax(tlogits.reshape(B, -1), axis=-1).reshape(B, C, H, W)

    loss = kl_loss(pred, target)
    jax.block_until_ready(loss)

    # Reference check in plain JAX (PyTorch xlogy semantics for t >= 0).
    ref = jnp.sum(
        jnp.where(target > 0,
                  target * jnp.log(jnp.where(target > 0, target, 1.0)),
                  0.0)
        - target * pred,
        axis=(1, 2, 3),
    )
    assert jnp.allclose(loss, ref, atol=1e-5, rtol=1e-5), (loss, ref)

    print("KERNEL_OK")
</pallas_src>

<mosaic_0001>
module attributes {stable_mosaic.version = 11 : i64} {
  func.func @_kl_loss_kernel(%arg0: i32, %arg1: i32, %arg2: memref<8x1024xf32, #tpu.memory_space<vmem>>, %arg3: memref<8x1024xf32, #tpu.memory_space<vmem>>, %arg4: memref<8x1xf32, #tpu.memory_space<vmem>>, %arg5: memref<8x128xf32, #tpu.memory_space<vmem>>) attributes {dimension_semantics = [#tpu.dimension_semantics<parallel>, #tpu.dimension_semantics<arbitrary>], iteration_bounds = array<i64: 1, 1>, scalar_prefetch = 0 : i64, scratch_operands = 1 : i64, tpu.core_type = #tpu.core_type<tc>, window_params = [{transform_indices = @transform_0, window_bounds = array<i64: 8, 1024>}, {transform_indices = @transform_1, window_bounds = array<i64: 8, 1024>}, {transform_indices = @transform_2, window_bounds = array<i64: 8, 1>}]} {
    %c0_i32 = arith.constant 0 : i32
    %0 = arith.cmpi eq, %arg1, %c0_i32 : i32
    %1 = arith.extui %0 : i1 to i32
    %c0_i32_0 = arith.constant 0 : i32
    %2 = arith.cmpi ne, %1, %c0_i32_0 : i32
    scf.if %2 {
      %cst_63 = arith.constant 0.000000e+00 : f32
      %122 = vector.broadcast %cst_63 : f32 to vector<8x128xf32>
      %c0_64 = arith.constant 0 : index
      %c0_65 = arith.constant 0 : index
      %123 = vector.load %arg5[%c0_64, %c0_65] : memref<8x128xf32, #tpu.memory_space<vmem>>, vector<8x128xf32>
      tpu.vector_store %arg5[%c0_64, %c0_65], %122 {strides = array<i32>} : memref<8x128xf32, #tpu.memory_space<vmem>>, vector<8x128xf32>,
    } else {
    }
    %cst = arith.constant 0.000000e+00 : f32
    %3 = vector.broadcast %cst : f32 to vector<8x128xf32>
    %c0 = arith.constant 0 : index
    %c0_1 = arith.constant 0 : index
    %4 = vector.load %arg3[%c0, %c0_1] : memref<8x1024xf32, #tpu.memory_space<vmem>>, vector<8x128xf32>
    %c0_2 = arith.constant 0 : index
    %c0_3 = arith.constant 0 : index
    %5 = vector.load %arg2[%c0_2, %c0_3] : memref<8x1024xf32, #tpu.memory_space<vmem>>, vector<8x128xf32>
    %cst_4 = arith.constant 0.000000e+00 : f32
    %6 = vector.broadcast %cst_4 : f32 to vector<8x128xf32>
    %7 = arith.cmpf ogt, %4, %6 : vector<8x128xf32>
    %cst_5 = arith.constant 1.000000e+00 : f32
    %8 = vector.broadcast %cst_5 : f32 to vector<8x128xf32>
    %9 = arith.select %7, %4, %8 : vector<8x128xi1>, vector<8x128xf32>
    %cst_6 = arith.constant 0.000000e+00 : f32
    %10 = vector.broadcast %cst_6 : f32 to vector<8x128xf32>
    %11 = arith.cmpf ogt, %4, %10 : vector<8x128xf32>
    %12 = math.log %9 : vector<8x128xf32>
    %13 = arith.subf %12, %5 : vector<8x128xf32>
    %14 = arith.mulf %4, %13 : vector<8x128xf32>
    %cst_7 = arith.constant 0.000000e+00 : f32
    %15 = vector.broadcast %cst_7 : f32 to vector<8x128xf32>
    %16 = arith.select %11, %14, %15 : vector<8x128xi1>, vector<8x128xf32>
    %17 = arith.addf %3, %16 : vector<8x128xf32>
    %c0_8 = arith.constant 0 : index
    %c128 = arith.constant 128 : index
    %18 = vector.load %arg3[%c0_8, %c128] : memref<8x1024xf32, #tpu.memory_space<vmem>>, vector<8x128xf32>
    %c0_9 = arith.constant 0 : index
    %c128_10 = arith.constant 128 : index
    %19 = vector.load %arg2[%c0_9, %c128_10] : memref<8x1024xf32, #tpu.memory_space<vmem>>, vector<8x128xf32>
    %cst_11 = arith.constant 0.000000e+00 : f32
    %20 = vector.broadcast %cst_11 : f32 to vector<8x128xf32>
    %21 = arith.cmpf ogt, %18, %20 : vector<8x128xf32>
    %cst_12 = arith.constant 1.000000e+00 : f32
    %22 = vector.broadcast %cst_12 : f32 to vector<8x128xf32>
    %23 = arith.select %21, %18, %22 : vector<8x128xi1>, vector<8x128xf32>
    %cst_13 = arith.constant 0.000000e+00 : f32
    %24 = vector.broadcast %cst_13 : f32 to vector<8x128xf32>
    %25 = arith.cmpf ogt, %18, %24 : vector<8x128xf32>
    %26 = math.log %23 : vector<8x128xf32>
    %27 = arith.subf %26, %19 : vector<8x128xf32>
    %28 = arith.mulf %18, %27 : vector<8x128xf32>
    %cst_14 = arith.constant 0.000000e+00 : f32
    %29 = vector.broadcast %cst_14 : f32 to vector<8x128xf32>
    %30 = arith.select %25, %28, %29 : vector<8x128xi1>, vector<8x128xf32>
    %31 = arith.addf %17, %30 : vector<8x128xf32>
    %c0_15 = arith.constant 0 : index
    %c256 = arith.constant 256 : index
    %32 = vector.load %arg3[%c0_15, %c256] : memref<8x1024xf32, #tpu.memory_space<vmem>>, vector<8x128xf32>
    %c0_16 = arith.constant 0 : index
    %c256_17 = arith.constant 256 : index
    %33 = vector.load %arg2[%c0_16, %c256_17] : memref<8x1024xf32, #tpu.memory_space<vmem>>, vector<8x128xf32>
    %cst_18 = arith.constant 0.000000e+00 : f32
    %34 = vector.broadcast %cst_18 : f32 to vector<8x128xf32>
    %35 = arith.cmpf ogt, %32, %34 : vector<8x128xf32>
    %cst_19 = arith.constant 1.000000e+00 : f32
    %36 = vector.broadcast %cst_19 : f32 to vector<8x128xf32>
    %37 = arith.select %35, %32, %36 : vector<8x128xi1>, vector<8x128xf32>
    %cst_20 = arith.constant 0.000000e+00 : f32
    %38 = vector.broadcast %cst_20 : f32 to vector<8x128xf32>
    %39 = arith.cmpf ogt, %32, %38 : vector<8x128xf32>
    %40 = math.log %37 : vector<8x128xf32>
    %41 = arith.subf %40, %33 : vector<8x128xf32>
    %42 = arith.mulf %32, %41 : vector<8x128xf32>
    %cst_21 = arith.constant 0.000000e+00 : f32
    %43 = vector.broadcast %cst_21 : f32 to vector<8x128xf32>
    %44 = arith.select %39, %42, %43 : vector<8x128xi1>, vector<8x128xf32>
    %45 = arith.addf %31, %44 : vector<8x128xf32>
    %c0_22 = arith.constant 0 : index
    %c384 = arith.constant 384 : index
    %46 = vector.load %arg3[%c0_22, %c384] : memref<8x1024xf32, #tpu.memory_space<vmem>>, vector<8x128xf32>
    %c0_23 = arith.constant 0 : index
    %c384_24 = arith.constant 384 : index
    %47 = vector.load %arg2[%c0_23, %c384_24] : memref<8x1024xf32, #tpu.memory_space<vmem>>, vector<8x128xf32>
    %cst_25 = arith.constant 0.000000e+00 : f32
    %48 = vector.broadcast %cst_25 : f32 to vector<8x128xf32>
    %49 = arith.cmpf ogt, %46, %48 : vector<8x128xf32>
    %cst_26 = arith.constant 1.000000e+00 : f32
    %50 = vector.broadcast %cst_26 : f32 to vector<8x128xf32>
    %51 = arith.select %49, %46, %50 : vector<8x128xi1>, vector<8x128xf32>
    %cst_27 = arith.constant 0.000000e+00 : f32
    %52 = vector.broadcast %cst_27 : f32 to vector<8x128xf32>
    %53 = arith.cmpf ogt, %46, %52 : vector<8x128xf32>
    %54 = math.log %51 : vector<8x128xf32>
    %55 = arith.subf %54, %47 : vector<8x128xf32>
    %56 = arith.mulf %46, %55 : vector<8x128xf32>
    %cst_28 = arith.constant 0.000000e+00 : f32
    %57 = vector.broadcast %cst_28 : f32 to vector<8x128xf32>
    %58 = arith.select %53, %56, %57 : vector<8x128xi1>, vector<8x128xf32>
    %59 = arith.addf %45, %58 : vector<8x128xf32>
    %c0_29 = arith.constant 0 : index
    %c512 = arith.constant 512 : index
    %60 = vector.load %arg3[%c0_29, %c512] : memref<8x1024xf32, #tpu.memory_space<vmem>>, vector<8x128xf32>
    %c0_30 = arith.constant 0 : index
    %c512_31 = arith.constant 512 : index
    %61 = vector.load %arg2[%c0_30, %c512_31] : memref<8x1024xf32, #tpu.memory_space<vmem>>, vector<8x128xf32>
    %cst_32 = arith.constant 0.000000e+00 : f32
    %62 = vector.broadcast %cst_32 : f32 to vector<8x128xf32>
    %63 = arith.cmpf ogt, %60, %62 : vector<8x128xf32>
    %cst_33 = arith.constant 1.000000e+00 : f32
    %64 = vector.broadcast %cst_33 : f32 to vector<8x128xf32>
    %65 = arith.select %63, %60, %64 : vector<8x128xi1>, vector<8x128xf32>
    %cst_34 = arith.constant 0.000000e+00 : f32
    %66 = vector.broadcast %cst_34 : f32 to vector<8x128xf32>
    %67 = arith.cmpf ogt, %60, %66 : vector<8x128xf32>
    %68 = math.log %65 : vector<8x128xf32>
    %69 = arith.subf %68, %61 : vector<8x128xf32>
    %70 = arith.mulf %60, %69 : vector<8x128xf32>
    %cst_35 = arith.constant 0.000000e+00 : f32
    %71 = vector.broadcast %cst_35 : f32 to vector<8x128xf32>
    %72 = arith.select %67, %70, %71 : vector<8x128xi1>, vector<8x128xf32>
    %73 = arith.addf %59, %72 : vector<8x128xf32>
    %c0_36 = arith.constant 0 : index
    %c640 = arith.constant 640 : index
    %74 = vector.load %arg3[%c0_36, %c640] : memref<8x1024xf32, #tpu.memory_space<vmem>>, vector<8x128xf32>
    %c0_37 = arith.constant 0 : index
    %c640_38 = arith.constant 640 : index
    %75 = vector.load %arg2[%c0_37, %c640_38] : memref<8x1024xf32, #tpu.memory_space<vmem>>, vector<8x128xf32>
    %cst_39 = arith.constant 0.000000e+00 : f32
    %76 = vector.broadcast %cst_39 : f32 to vector<8x128xf32>
    %77 = arith.cmpf ogt, %74, %76 : vector<8x128xf32>
    %cst_40 = arith.constant 1.000000e+00 : f32
    %78 = vector.broadcast %cst_40 : f32 to vector<8x128xf32>
    %79 = arith.select %77, %74, %78 : vector<8x128xi1>, vector<8x128xf32>
    %cst_41 = arith.constant 0.000000e+00 : f32
    %80 = vector.broadcast %cst_41 : f32 to vector<8x128xf32>
    %81 = arith.cmpf ogt, %74, %80 : vector<8x128xf32>
    %82 = math.log %79 : vector<8x128xf32>
    %83 = arith.subf %82, %75 : vector<8x128xf32>
    %84 = arith.mulf %74, %83 : vector<8x128xf32>
    %cst_42 = arith.constant 0.000000e+00 : f32
    %85 = vector.broadcast %cst_42 : f32 to vector<8x128xf32>
    %86 = arith.select %81, %84, %85 : vector<8x128xi1>, vector<8x128xf32>
    %87 = arith.addf %73, %86 : vector<8x128xf32>
    %c0_43 = arith.constant 0 : index
    %c768 = arith.constant 768 : index
    %88 = vector.load %arg3[%c0_43, %c768] : memref<8x1024xf32, #tpu.memory_space<vmem>>, vector<8x128xf32>
    %c0_44 = arith.constant 0 : index
    %c768_45 = arith.constant 768 : index
    %89 = vector.load %arg2[%c0_44, %c768_45] : memref<8x1024xf32, #tpu.memory_space<vmem>>, vector<8x128xf32>
    %cst_46 = arith.constant 0.000000e+00 : f32
    %90 = vector.broadcast %cst_46 : f32 to vector<8x128xf32>
    %91 = arith.cmpf ogt, %88, %90 : vector<8x128xf32>
    %cst_47 = arith.constant 1.000000e+00 : f32
    %92 = vector.broadcast %cst_47 : f32 to vector<8x128xf32>
    %93 = arith.select %91, %88, %92 : vector<8x128xi1>, vector<8x128xf32>
    %cst_48 = arith.constant 0.000000e+00 : f32
    %94 = vector.broadcast %cst_48 : f32 to vector<8x128xf32>
    %95 = arith.cmpf ogt, %88, %94 : vector<8x128xf32>
    %96 = math.log %93 : vector<8x128xf32>
    %97 = arith.subf %96, %89 : vector<8x128xf32>
    %98 = arith.mulf %88, %97 : vector<8x128xf32>
    %cst_49 = arith.constant 0.000000e+00 : f32
    %99 = vector.broadcast %cst_49 : f32 to vector<8x128xf32>
    %100 = arith.select %95, %98, %99 : vector<8x128xi1>, vector<8x128xf32>
    %101 = arith.addf %87, %100 : vector<8x128xf32>
    %c0_50 = arith.constant 0 : index
    %c896 = arith.constant 896 : index
    %102 = vector.load %arg3[%c0_50, %c896] : memref<8x1024xf32, #tpu.memory_space<vmem>>, vector<8x128xf32>
    %c0_51 = arith.constant 0 : index
    %c896_52 = arith.constant 896 : index
    %103 = vector.load %arg2[%c0_51, %c896_52] : memref<8x1024xf32, #tpu.memory_space<vmem>>, vector<8x128xf32>
    %cst_53 = arith.constant 0.000000e+00 : f32
    %104 = vector.broadcast %cst_53 : f32 to vector<8x128xf32>
    %105 = arith.cmpf ogt, %102, %104 : vector<8x128xf32>
    %cst_54 = arith.constant 1.000000e+00 : f32
    %106 = vector.broadcast %cst_54 : f32 to vector<8x128xf32>
    %107 = arith.select %105, %102, %106 : vector<8x128xi1>, vector<8x128xf32>
    %cst_55 = arith.constant 0.000000e+00 : f32
    %108 = vector.broadcast %cst_55 : f32 to vector<8x128xf32>
    %109 = arith.cmpf ogt, %102, %108 : vector<8x128xf32>
    %110 = math.log %107 : vector<8x128xf32>
    %111 = arith.subf %110, %103 : vector<8x128xf32>
    %112 = arith.mulf %102, %111 : vector<8x128xf32>
    %cst_56 = arith.constant 0.000000e+00 : f32
    %113 = vector.broadcast %cst_56 : f32 to vector<8x128xf32>
    %114 = arith.select %109, %112, %113 : vector<8x128xi1>, vector<8x128xf32>
    %115 = arith.addf %101, %114 : vector<8x128xf32>
    %c0_57 = arith.constant 0 : index
    %c0_58 = arith.constant 0 : index
    %116 = vector.load %arg5[%c0_57, %c0_58] : memref<8x128xf32, #tpu.memory_space<vmem>>, vector<8x128xf32>
    %117 = arith.addf %116, %115 : vector<8x128xf32>
    %c0_59 = arith.constant 0 : index
    %c0_60 = arith.constant 0 : index
    %118 = vector.load %arg5[%c0_59, %c0_60] : memref<8x128xf32, #tpu.memory_space<vmem>>, vector<8x128xf32>
    tpu.vector_store %arg5[%c0_59, %c0_60], %117 {strides = array<i32>} : memref<8x128xf32, #tpu.memory_space<vmem>>, vector<8x128xf32>,
    %c0_i32_61 = arith.constant 0 : i32
    %119 = arith.cmpi eq, %arg1, %c0_i32_61 : i32
    %120 = arith.extui %119 : i1 to i32
    %c0_i32_62 = arith.constant 0 : i32
    %121 = arith.cmpi ne, %120, %c0_i32_62 : i32
    scf.if %121 {
      %c0_63 = arith.constant 0 : index
      %c0_64 = arith.constant 0 : index
      %122 = vector.load %arg5[%c0_63, %c0_64] : memref<8x128xf32, #tpu.memory_space<vmem>>, vector<8x128xf32>
      %cst_65 = arith.constant dense<0.000000e+00> : vector<8xf32>
      %123 = vector.multi_reduction <add>, %122, %cst_65 [1] : vector<8x128xf32> to vector<8xf32>
      %124 = vector.shape_cast %123 : vector<8xf32> to vector<8x1xf32>
      %c0_66 = arith.constant 0 : index
      %c0_67 = arith.constant 0 : index
      %125 = vector.load %arg4[%c0_66, %c0_67] : memref<8x1xf32, #tpu.memory_space<vmem>>, vector<8x1xf32>
      tpu.vector_store %arg4[%c0_66, %c0_67], %124 {strides = array<i32>} : memref<8x1xf32, #tpu.memory_space<vmem>>, vector<8x1xf32>,
    } else {
    }
    return
  }
  func.func @transform_0(%arg0: i32, %arg1: i32) -> (i32, i32) {
    %c0_i32 = arith.constant 0 : i32
    return %arg0, %arg1 : i32, i32
  }
  func.func @transform_1(%arg0: i32, %arg1: i32) -> (i32, i32) {
    %c0_i32 = arith.constant 0 : i32
    return %arg0, %arg1 : i32, i32
  }
  func.func @transform_2(%arg0: i32, %arg1: i32) -> (i32, i32) {
    %c0_i32 = arith.constant 0 : i32
    %c0_i32_0 = arith.constant 0 : i32
    return %arg0, %c0_i32 : i32, i32
  }
}

</mosaic_0001>

<bundles_post_ra>
// kernel: tpu_custom_call.1
= control target key start
LH: loop header
LB: loop body
LE: loop exit
PB: predicated region body
PF: predicated region fallthrough
CT: control target
= control target key end

     0   :  { %7 = vsyncpa [#allocation4], 0  ;;  %s302_s0 = inlined_call_operand.hbm [shape: f32[8,1024], index: 0, kind: input, shape index: {}]   ;;  %s303_s1 = inlined_call_operand.hbm [shape: f32[8,1024], index: 1, kind: input, shape index: {}]   ;;  %s304_s2 = inlined_call_operand.vmem [shape: f32[8,1], index: 2, kind: output, shape index: {}]  }
   0x1   :  { %s14_s11 = sshll.u32 %s302_s0, 4  ;;  %s15_s11 = int_to_ptr.hbm [resolvable:$true] %s14_s11 }
   0x2   :  { %8 = vsyncpa [#allocation6], 0  ;;  %s211_s12 = smov [#allocation3]   ;;  %s25_s16 = sshll.u32 %s303_s1, 4  ;;  %s26_s16 = int_to_ptr.hbm [resolvable:$true] %s25_s16 }
   0x3   :  { %s16_s13 = sshll.u32 %s211_s12, 4  ;;  %s212_s17 = smov [#allocation5]   ;;  %s17_s13 = int_to_ptr.vmem [resolvable:$true] %s16_s13 }
   0x4   :  { %19 = dma.hbm_to_vmem [thread:$0]  %s15_s11, 1024, %s17_s13, [#allocation4]  }
   0x5   :  { %s27_s18 = sshll.u32 %s212_s17, 4  ;;  %s28_s18 = int_to_ptr.vmem [resolvable:$true] %s27_s18 }
   0x6   :  { %30 = dma.hbm_to_vmem [thread:$0]  %s26_s16, 1024, %s28_s18, [#allocation6]  }
   0x7   :  { %207 = dma.done.wait [#allocation4], 1024  }
   0x8   :  { %208 = vsyncadd [#allocation4], 4294966272 }
   0x9   :  { %209 = dma.done.wait [#allocation6], 1024  }
   0xa   :  { %210 = vsyncadd [#allocation6], 4294966272  ;;  %v44_v0 = vld [vmem:[#allocation5] sm:$0xff]  ;;  %v234_v1 = vld [vmem:[#allocation5 + $0x8] sm:$0xff]  ;;  %vm133_vm8 = vcmask 7168  }
   0xb   :  { %vm46_vm0 = vcmp.gt.f32.partialorder %v44_v0, 0.0  ;;  %vm56_vm1 = vcmp.gt.f32.partialorder %v234_v1, 0.0  ;;  %v237_v2 = vld [vmem:[#allocation5 + $0x10] sm:$0xff]  ;;  %v244_v5 = vld [vmem:[#allocation5 + $0x18] sm:$0xff]  ;;  %v246_v6 = vld [vmem:[#allocation5 + $0x20] sm:$0xff] }
   0xc   :  { %v47_v3 = vsel %vm46_vm0, %v44_v0, 1.0  ;;  %v57_v4 = vsel %vm56_vm1, %v234_v1, 1.0  ;;  %vm66_vm2 = vcmp.gt.f32.partialorder %v237_v2, 0.0  ;;  %vm76_vm3 = vcmp.gt.f32.partialorder %v244_v5, 0.0  ;;  %v253_v8 = vld [vmem:[#allocation5 + $0x28] sm:$0xff]  ;;  %v262_v11 = vld [vmem:[#allocation5 + $0x30] sm:$0xff] }
   0xd   :  { %143 = vlog2.f32 %v47_v3  ;;  %v67_v7 = vsel %vm66_vm2, %v237_v2, 1.0  ;;  %vm86_vm4 = vcmp.gt.f32.partialorder %v246_v6, 0.0  ;;  %v77_v9 = vsel %vm76_vm3, %v244_v5, 1.0  ;;  %v264_v12 = vld [vmem:[#allocation5 + $0x38] sm:$0xff]  ;;  %v45_v17 = vld [vmem:[#allocation3] sm:$0xff]  ;;  %v55_v20 = vld [vmem:[#allocation3 + $0x8] sm:$0xff] }
   0xe   :  { %145 = vlog2.f32 %v57_v4  ;;  %v87_v10 = vsel %vm86_vm4, %v246_v6, 1.0  ;;  %vm96_vm5 = vcmp.gt.f32.partialorder %v253_v8, 0.0  ;;  %vm106_vm6 = vcmp.gt.f32.partialorder %v262_v11, 0.0  ;;  %v65_v23 = vld [vmem:[#allocation3 + $0x10] sm:$0xff]  ;;  %v75_v27 = vld [vmem:[#allocation3 + $0x18] sm:$0xff]  ;;  %v85_v31 = vld [vmem:[#allocation3 + $0x20] sm:$0xff] }
   0xf   :  { %147 = vlog2.f32 %v67_v7  ;;  %v97_v13 = vsel %vm96_vm5, %v253_v8, 1.0  ;;  %vm116_vm7 = vcmp.gt.f32.partialorder %v264_v12, 0.0  ;;  %v107_v14 = vsel %vm106_vm6, %v262_v11, 1.0  ;;  %v95_v36 = vld [vmem:[#allocation3 + $0x28] sm:$0xff]  ;;  %v105_v41 = vld [vmem:[#allocation3 + $0x30] sm:$0xff]  ;;  %v115_v47 = vld [vmem:[#allocation3 + $0x38] sm:$0xff] }
  0x10   :  { %149 = vlog2.f32 %v77_v9  ;;  %v117_v15 = vsel %vm116_vm7, %v264_v12, 1.0 }
  0x11   :  { %151 = vlog2.f32 %v87_v10 }
  0x12   :  { %153 = vlog2.f32 %v97_v13 }
  0x13   :  { %v144_v16 = vpop.eup %143  ;;  %155 = vlog2.f32 %v107_v14 }
  0x14   :  { %v146_v18 = vpop.eup %145  ;;  %v49_v19 = vmul.f32 0.6931472, %v144_v16  ;;  %157 = vlog2.f32 %v117_v15 }
  0x15   :  { %v148_v21 = vpop.eup %147  ;;  %v59_v22 = vmul.f32 0.6931472, %v146_v18 }
  0x16   :  { %v150_v24 = vpop.eup %149  ;;  %v50_v25 = vsub.f32 %v49_v19, %v45_v17  ;;  %v69_v26 = vmul.f32 0.6931472, %v148_v21 }
  0x17   :  { %v152_v28 = vpop.eup %151  ;;  %v60_v29 = vsub.f32 %v59_v22, %v55_v20  ;;  %v79_v30 = vmul.f32 0.6931472, %v150_v24 }
  0x18   :  { %v154_v32 = vpop.eup %153  ;;  %v51_v33 = vmul.f32 %v50_v25, %v44_v0  ;;  %v70_v34 = vsub.f32 %v69_v26, %v65_v23  ;;  %v89_v35 = vmul.f32 0.6931472, %v152_v28 }
  0x19   :  { %v156_v37 = vpop.eup %155  ;;  %v61_v38 = vmul.f32 %v60_v29, %v234_v1  ;;  %v80_v39 = vsub.f32 %v79_v30, %v75_v27  ;;  %v99_v40 = vmul.f32 0.6931472, %v154_v32 }
  0x1a   :  { %v158_v42 = vpop.eup %157  ;;  %v52_v43 = vsel %vm46_vm0, %v51_v33, 0.0  ;;  %v71_v44 = vmul.f32 %v70_v34, %v237_v2  ;;  %v90_v45 = vsub.f32 %v89_v35, %v85_v31  ;;  %v109_v46 = vmul.f32 0.6931472, %v156_v37 }
  0x1b   :  { %v62_v48 = vsel %vm56_vm1, %v61_v38, 0.0  ;;  %v81_v49 = vmul.f32 %v80_v39, %v244_v5  ;;  %v100_v50 = vsub.f32 %v99_v40, %v95_v36  ;;  %v119_v51 = vmul.f32 0.6931472, %v158_v42 }
  0x1c   :  { %v63_v52 = vadd.f32 %v62_v48, %v52_v43  ;;  %v72_v53 = vsel %vm66_vm2, %v71_v44, 0.0  ;;  %v91_v54 = vmul.f32 %v90_v45, %v246_v6  ;;  %v110_v55 = vsub.f32 %v109_v46, %v105_v41 }
  0x1d   :  { %v82_v56 = vsel %vm76_vm3, %v81_v49, 0.0  ;;  %v101_v57 = vmul.f32 %v100_v50, %v253_v8  ;;  %v120_v58 = vsub.f32 %v119_v51, %v115_v47 }
  0x1e   :  { %v73_v59 = vadd.f32 %v72_v53, %v63_v52  ;;  %v92_v60 = vsel %vm86_vm4, %v91_v54, 0.0  ;;  %v111_v61 = vmul.f32 %v110_v55, %v262_v11 }
  0x1f   :  { %v102_v63 = vsel %vm96_vm5, %v101_v57, 0.0  ;;  %v121_v0 = vmul.f32 %v120_v58, %v264_v12 }
  0x20   :  { %v83_v62 = vadd.f32 %v82_v56, %v73_v59  ;;  %v112_v2 = vsel %vm106_vm6, %v111_v61, 0.0 }
  0x21   :  { %v122_v4 = vsel %vm116_vm7, %v121_v0, 0.0 }
  0x22   :  { %v93_v1 = vadd.f32 %v92_v60, %v83_v62 }
  0x24   :  { %v103_v3 = vadd.f32 %v102_v63, %v93_v1 }
  0x26   :  { %v113_v5 = vadd.f32 %v112_v2, %v103_v3 }
  0x28   :  { %v123_v7 = vadd.f32 %v122_v4, %v113_v5 }
  0x2a   :  { %131 = vadd.xlane.f32.xlu0 %v123_v7 }
  0x9d   :  { %v132_v6 = vpop.xlane.xlu0 %131 }
  0x9e   :  { %134 = vst.msk [vmem:[%s304_s2] sm:$0xff] %vm133_vm8, %v132_v6 }
  0x9f   :  { %139 = vsyncpa [#allocation4], 1 }
  0xa0   :  { %140 = vsyncpa [#allocation6], 1 }

</bundles_post_ra>
